<compile_context>
chip_gen: v7x
topology: tpu7x:2x2x1
jax: 0.10.0
libtpu: 0.0.40
codegen_flags: <defaults>
</compile_context>

<pallas_src>
import functools

import jax
import jax.numpy as jnp
from jax import lax
from jax.experimental import pallas as pl
from jax.experimental.pallas import tpu as pltpu


def _focal_loss_kernel(logits_ref, targets_ref, out_ref, *, alpha, gamma, gamma_int):
    # One (TN, C) tile of logits and (TN, 1) int32 targets are resident in VMEM.
    x = logits_ref[...].astype(jnp.float32)                  # (TN, C), upcast after DMA
    t = targets_ref[...]                                     # (TN, 1) int32

    # Numerically stable log-sum-exp pieces (one EUP pass, one max, one sum).
    m = jnp.max(x, axis=-1, keepdims=True)                   # (TN, 1)   (XLU)
    e = jnp.exp(x - m)                                       # (TN, C)   (EUP)
    sumexp = jnp.sum(e, axis=-1, keepdims=True)              # (TN, 1)   (XLU)

    # Target-class logit gather via iota/compare/select (VPU) + one reduction.
    col = lax.broadcasted_iota(jnp.int32, x.shape, 1)        # (TN, C)
    hit = col == t                                           # (TN, C) bool
    tgt_logit = jnp.sum(jnp.where(hit, x, 0.0), axis=-1, keepdims=True)   # (TN, 1)

    # Cross entropy (stable form); pt = exp(-ce) exactly as in the PyTorch module.
    ce = (jnp.log(sumexp) + m) - tgt_logit                   # (TN, 1)
    pt = jnp.exp(-ce)                                        # (TN, 1)   cheap column EUP op

    # Focal modulation; clamp avoids a negative base when ce rounds slightly < 0.
    omp = jnp.maximum(1.0 - pt, 0.0)
    if gamma_int is not None:
        mod = jnp.ones_like(omp)
        for _ in range(gamma_int):                           # gamma=2 -> omp*omp (VPU)
            mod = mod * omp
    else:
        mod = omp ** gamma                                   # non-integer gamma fallback

    out_ref[...] = (alpha * mod * ce).astype(out_ref.dtype)


def _pick_block_n(n, c, itemsize):
    """Row-tile size: big enough to amortize the ~0.35 us/step overhead, small
    enough that double-buffered logits tiles stay well inside scoped VMEM on
    v5e/v6e/v7x."""
    budget_bytes = 4 * 1024 * 1024                 # per logits buffer (x2 for double-buffer)
    bn = budget_bytes // max(1, c * itemsize)
    bn = max(8, min(1024, bn))
    bn = (bn // 8) * 8                             # sublane multiple
    bn = min(bn, max(8, ((n + 7) // 8) * 8))       # don't tile past the (padded) problem
    return int(bn)


def focal_loss_pallas(logits, targets, *, alpha=1.0, gamma=2.0, block_n=None):
    """logits: (N, C) float32/bf16; targets: (N,) int. Returns (N,) float32 focal
    loss (reduction='none', the module default)."""
    n, c = logits.shape
    if block_n is None:
        block_n = _pick_block_n(n, c, jnp.dtype(logits.dtype).itemsize)
    block_n = max(8, (int(block_n) // 8) * 8)

    g = pl.cdiv(n, block_n)
    n_pad = g * block_n
    if n_pad != n:
        # Pad the ragged tail (no runtime bounds checks on VMEM refs on TPU).
        logits = jnp.pad(logits, ((0, n_pad - n), (0, 0)))
        targets = jnp.pad(targets, (0, n_pad - n))
    targets_2d = targets.astype(jnp.int32).reshape(n_pad, 1)

    gamma_f = float(gamma)
    gamma_int = int(gamma_f) if (gamma_f.is_integer() and gamma_f >= 0) else None
    kernel = functools.partial(
        _focal_loss_kernel, alpha=float(alpha), gamma=gamma_f, gamma_int=gamma_int)

    out = pl.pallas_call(
        kernel,
        out_shape=jax.ShapeDtypeStruct((n_pad, 1), jnp.float32),
        grid=(g,),
        in_specs=[
            pl.BlockSpec((block_n, c), lambda i: (i, 0)),
            pl.BlockSpec((block_n, 1), lambda i: (i, 0)),
        ],
        out_specs=pl.BlockSpec((block_n, 1), lambda i: (i, 0)),
        compiler_params=pltpu.CompilerParams(
            dimension_semantics=("parallel",),          # rows independent -> megacore
            vmem_limit_bytes=32 * 1024 * 1024,          # explicit; tiles sized well under
        ),
    )(logits, targets_2d)
    return out[:n, 0]


def focal_loss_reference(logits, targets, *, alpha=1.0, gamma=2.0):
    # Pure-JAX reference for correctness checking.
    logp = jax.nn.log_softmax(logits.astype(jnp.float32), axis=-1)
    ce = -jnp.take_along_axis(logp, targets[:, None].astype(jnp.int32), axis=-1)[:, 0]
    pt = jnp.exp(-ce)
    return alpha * (1.0 - pt) ** gamma * ce


if __name__ == "__main__":
    key = jax.random.PRNGKey(0)
    k1, k2, k3, k4 = jax.random.split(key, 4)

    # Case 1: small shapes consistent with F.cross_entropy((N, C), (N,)).
    N, C = 8, 32
    logits = jax.random.normal(k1, (N, C), dtype=jnp.float32)
    targets = jax.random.randint(k2, (N,), 0, C, dtype=jnp.int32)

    out = jax.block_until_ready(focal_loss_pallas(logits, targets, alpha=1.0, gamma=2.0))
    ref = focal_loss_reference(logits, targets, alpha=1.0, gamma=2.0)
    assert out.shape == (N,)
    assert jnp.allclose(out, ref, atol=1e-4, rtol=1e-4), (out, ref)

    # Case 1b: bf16 logits path (upcast happens inside the kernel, after the DMA).
    logits_bf16 = logits.astype(jnp.bfloat16)
    out_bf = jax.block_until_ready(focal_loss_pallas(logits_bf16, targets))
    ref_bf = focal_loss_reference(logits_bf16, targets)
    assert jnp.allclose(out_bf, ref_bf, atol=1e-4, rtol=1e-4), (out_bf, ref_bf)

    # Case 2: multi-tile grid with a ragged tail (N % block_n != 0).
    N2, C2 = 300, 40
    logits2 = jax.random.normal(k3, (N2, C2), dtype=jnp.float32)
    targets2 = jax.random.randint(k4, (N2,), 0, C2, dtype=jnp.int32)
    out2 = jax.block_until_ready(
        focal_loss_pallas(logits2, targets2, alpha=0.25, gamma=2.0, block_n=128))
    ref2 = focal_loss_reference(logits2, targets2, alpha=0.25, gamma=2.0)
    assert out2.shape == (N2,)
    assert jnp.allclose(out2, ref2, atol=1e-4, rtol=1e-4), (out2, ref2)

    # TODO(synk): reduction='mean'/'sum' variants of the module are left to a
    # trivial jnp.mean/jnp.sum over this kernel's 'none' output.
    print("KERNEL_OK")
</pallas_src>

<mosaic_0001>
module attributes {stable_mosaic.version = 11 : i64} {
  func.func @_focal_loss_kernel(%arg0: i32, %arg1: memref<8x32xf32, #tpu.memory_space<vmem>>, %arg2: memref<8x1xi32, #tpu.memory_space<vmem>>, %arg3: memref<8x1xf32, #tpu.memory_space<vmem>>) attributes {dimension_semantics = [#tpu.dimension_semantics<parallel>], iteration_bounds = array<i64: 1>, scalar_prefetch = 0 : i64, scratch_operands = 0 : i64, tpu.core_type = #tpu.core_type<tc>, window_params = [{transform_indices = @transform_0, window_bounds = array<i64: 8, 32>}, {transform_indices = @transform_1, window_bounds = array<i64: 8, 1>}, {transform_indices = @transform_2, window_bounds = array<i64: 8, 1>}]} {
    %c0 = arith.constant 0 : index
    %c0_0 = arith.constant 0 : index
    %0 = vector.load %arg1[%c0, %c0_0] : memref<8x32xf32, #tpu.memory_space<vmem>>, vector<8x32xf32>
    %c0_1 = arith.constant 0 : index
    %c0_2 = arith.constant 0 : index
    %1 = vector.load %arg2[%c0_1, %c0_2] : memref<8x1xi32, #tpu.memory_space<vmem>>, vector<8x1xi32>
    %cst = arith.constant dense<0xFF800000> : vector<8xf32>
    %2 = vector.multi_reduction <maximumf>, %0, %cst [1] : vector<8x32xf32> to vector<8xf32>
    %3 = vector.shape_cast %2 : vector<8xf32> to vector<8x1xf32>
    %4 = vector.broadcast %3 : vector<8x1xf32> to vector<8x32xf32>
    %5 = arith.subf %0, %4 : vector<8x32xf32>
    %6 = math.exp %5 : vector<8x32xf32>
    %cst_3 = arith.constant dense<0.000000e+00> : vector<8xf32>
    %7 = vector.multi_reduction <add>, %6, %cst_3 [1] : vector<8x32xf32> to vector<8xf32>
    %8 = vector.shape_cast %7 : vector<8xf32> to vector<8x1xf32>
    %9 = tpu.iota {dimensions = array<i32: 1>} : vector<8x32xi32>
    %10 = vector.broadcast %1 : vector<8x1xi32> to vector<8x32xi32>
    %11 = arith.cmpi eq, %9, %10 : vector<8x32xi32>
    %cst_4 = arith.constant 0.000000e+00 : f32
    %12 = vector.broadcast %cst_4 : f32 to vector<8x32xf32>
    %13 = arith.select %11, %0, %12 : vector<8x32xi1>, vector<8x32xf32>
    %cst_5 = arith.constant dense<0.000000e+00> : vector<8xf32>
    %14 = vector.multi_reduction <add>, %13, %cst_5 [1] : vector<8x32xf32> to vector<8xf32>
    %15 = vector.shape_cast %14 : vector<8xf32> to vector<8x1xf32>
    %16 = math.log %8 : vector<8x1xf32>
    %17 = arith.addf %16, %3 : vector<8x1xf32>
    %18 = arith.subf %17, %15 : vector<8x1xf32>
    %cst_6 = arith.constant 0.000000e+00 : f32
    %19 = vector.broadcast %cst_6 : f32 to vector<8x1xf32>
    %20 = arith.subf %19, %18 : vector<8x1xf32>
    %21 = math.exp %20 : vector<8x1xf32>
    %cst_7 = arith.constant 1.000000e+00 : f32
    %22 = vector.broadcast %cst_7 : f32 to vector<8x1xf32>
    %23 = arith.subf %22, %21 : vector<8x1xf32>
    %cst_8 = arith.constant 0.000000e+00 : f32
    %24 = vector.broadcast %cst_8 : f32 to vector<8x1xf32>
    %25 = arith.maximumf %23, %24 : vector<8x1xf32>
    %cst_9 = arith.constant 1.000000e+00 : f32
    %26 = vector.broadcast %cst_9 : f32 to vector<8x1xf32>
    %27 = arith.mulf %26, %25 : vector<8x1xf32>
    %28 = arith.mulf %27, %25 : vector<8x1xf32>
    %cst_10 = arith.constant 1.000000e+00 : f32
    %29 = vector.broadcast %cst_10 : f32 to vector<8x1xf32>
    %30 = arith.mulf %29, %28 : vector<8x1xf32>
    %31 = arith.mulf %30, %18 : vector<8x1xf32>
    %c0_11 = arith.constant 0 : index
    %c0_12 = arith.constant 0 : index
    %32 = vector.load %arg3[%c0_11, %c0_12] : memref<8x1xf32, #tpu.memory_space<vmem>>, vector<8x1xf32>
    tpu.vector_store %arg3[%c0_11, %c0_12], %31 {strides = array<i32>} : memref<8x1xf32, #tpu.memory_space<vmem>>, vector<8x1xf32>,
    return
  }
  func.func @transform_0(%arg0: i32) -> (i32, i32) {
    %c0_i32 = arith.constant 0 : i32
    %c0_i32_0 = arith.constant 0 : i32
    return %arg0, %c0_i32 : i32, i32
  }
  func.func @transform_1(%arg0: i32) -> (i32, i32) {
    %c0_i32 = arith.constant 0 : i32
    %c0_i32_0 = arith.constant 0 : i32
    return %arg0, %c0_i32 : i32, i32
  }
  func.func @transform_2(%arg0: i32) -> (i32, i32) {
    %c0_i32 = arith.constant 0 : i32
    %c0_i32_0 = arith.constant 0 : i32
    return %arg0, %c0_i32 : i32, i32
  }
}

</mosaic_0001>

<bundles_post_ra>
// kernel: tpu_custom_call.1
= control target key start
LH: loop header
LB: loop body
LE: loop exit
PB: predicated region body
PF: predicated region fallthrough
CT: control target
= control target key end

     0   :  { %vm13_vm0 = vcmask 261120   ;;  %v58_v1 = vmov 0   ;;  %v23_v7 = vlaneseq  ;;  %vm44_vm2 = vcmask 7168   ;;  %s86_s0 = inlined_call_operand.vmem [shape: f32[8,32], index: 0, kind: input, shape index: {}]   ;;  %s87_s1 = inlined_call_operand.vmem [shape: s32[8,1], index: 1, kind: input, shape index: {}]   ;;  %s88_s2 = inlined_call_operand.vmem [shape: f32[8,1], index: 2, kind: output, shape index: {}]  }
   0x1   :  { %v11_v0 = vld [vmem:[%s86_s0] sm:$0xff]  ;;  %51 = vset.pattern.permute.xlu0 %v58_v1 }
   0x2   :  { %v14_v2 = vsel %vm13_vm0, %v11_v0, -inf  ;;  %v12_v3 = vld [vmem:[%s87_s1] sm:$0xff]  ;;  %v24_v8 = vand.u32 127, %v23_v7 }
   0x3   :  { %15 = vmax.xlane.f32.xlu0 %v14_v2 }
  0x19   :  { %26 = vperm.xlu0 %51, %v12_v3  }
  0x90   :  { %v16_v4 = vpop.xlane.xlu0 %15 }
  0x91   :  { %v17_v5 = vsub.f32 %v11_v0, %v16_v4 }
  0x93   :  { %v18_v6 = vmul.f32 1.442695, %v17_v5 }
  0x95   :  { %52 = vpow2.f32 %v18_v6 }
  0x98   :  { %v27_v9 = vpop.permute.xlu0 %26 }
  0x99   :  { %vm28_vm1 = vcmp.eq.s32.totalorder %v24_v8, %v27_v9 }
  0x9a   :  { %v29_v11 = vsel %vm28_vm1, %v11_v0, 0.0 }
  0x9b   :  { %v30_v13 = vsel %vm13_vm0, %v29_v11, 0.0 }
  0x9f   :  { %v53_v10 = vpop.eup %52 }
  0xa0   :  { %v20_v12 = vsel %vm13_vm0, %v53_v10, 0.0 }
  0xa1   :  { %21 = vadd.xlane.f32.xlu1 %v20_v12 }
  0xa5   :  { %31 = vadd.xlane.f32.xlu1 %v30_v13 }
 0x12e   :  { %v22_v14 = vpop.xlane.xlu1 %21 }
 0x12f   :  { %54 = vlog2.f32 %v22_v14 }
 0x132   :  { %v32_v17 = vpop.xlane.xlu1 %31 }
 0x139   :  { %v55_v15 = vpop.eup %54 }
 0x13a   :  { %v34_v16 = vmul.f32 0.6931472, %v55_v15 }
 0x13c   :  { %v35_v18 = vadd.f32 %v34_v16, %v16_v4 }
 0x13e   :  { %v36_v19 = vsub.f32 %v35_v18, %v32_v17 }
 0x140   :  { %v37_v20 = vsub.f32 0.0, %v36_v19 }
 0x142   :  { %v38_v21 = vmul.f32 1.442695, %v37_v20 }
 0x144   :  { %56 = vpow2.f32 %v38_v21 }
 0x14e   :  { %v57_v22 = vpop.eup %56 }
 0x14f   :  { %v40_v23 = vsub.f32 1.0, %v57_v22 }
 0x151   :  { %v41_v24 = vmax.f32 %v40_v23, 0.0 }
 0x153   :  { %v42_v25 = vmul.f32 %v41_v24, %v41_v24 }
 0x155   :  { %v43_v26 = vmul.f32 %v42_v25, %v36_v19 }
 0x157   :  { %45 = vst.msk [vmem:[%s88_s2] sm:$0xff] %vm44_vm2, %v43_v26 }

</bundles_post_ra>
